<compile_context>
chip_gen: v6e
topology: v6e:2x2x1
jax: 0.10.0
libtpu: 0.0.40
codegen_flags: <defaults>
</compile_context>

<pallas_src>
import functools

import jax
import jax.numpy as jnp
from jax.experimental import pallas as pl
from jax.experimental.pallas import tpu as pltpu


def _round_up(x, m):
    return (x + m - 1) // m * m


def _dws_kernel(x_ref, wdw_ref, wpw_ref, out_ref, dw_ref, *, k2):
    """One (batch, spatial-tile) block per grid step.

    x_ref:   (K2, 1, C, PT)  K*K tap windows, spatial flattened + padded (lane axis)
    wdw_ref: (C, K2)         depthwise weights, one column per tap
    wpw_ref: (O, C)          pointwise 1x1 weights
    out_ref: (1, O, PT)      output block (lane-dense)
    dw_ref:  (C, PT) f32     VMEM scratch: depthwise accumulator
    """
    # Hoist the weight cast out of the tap loop (one cast, not K*K).
    wdw = wdw_ref[...].astype(jnp.float32)                     # (C, K2)

    # Depthwise: dw[c, p] = sum_t x_tap[t, c, p] * wdw[c, t]
    # Pure VPU multiply-accumulate on lane-dense (C, PT) tiles; no shifts,
    # no strided slices, no reshapes.
    dw_ref[...] = x_ref[0, 0].astype(jnp.float32) * wdw[:, 0:1]
    for t in range(1, k2):
        dw_ref[...] += x_ref[t, 0].astype(jnp.float32) * wdw[:, t:t + 1]

    # Pointwise 1x1: (O, C) @ (C, PT) on the MXU, f32 accumulation.
    # (For very small C this underfills the MXU but is still correct and cheap;
    #  for realistic C it is the right path.)
    out = jnp.dot(wpw_ref[...].astype(jnp.float32), dw_ref[...],
                  preferred_element_type=jnp.float32)          # (O, PT)
    out_ref[0] = out.astype(out_ref.dtype)


def depthwise_separable_conv(x, w_dw, w_pw, *, stride):
    """x: (N, C, H, W); w_dw: (C, 1, K, K); w_pw: (O, C, 1, 1). Returns (N, O, OH, OW)."""
    n, c, h, w = x.shape
    k = w_dw.shape[-1]
    o = w_pw.shape[0]
    s = stride
    oh = (h - k) // s + 1
    ow = (w - k) // s + 1
    p = oh * ow

    # Lane tile: multiple of 128, capped so the (K2, C, P_TILE) input block stays small.
    p_tile = min(512, _round_up(p, 128))
    p_pad = _round_up(p, p_tile)

    # ---- Wrapper-side layout plumbing (no arithmetic) ---------------------------
    # Extract the K*K (strided) tap windows once, flatten spatial to a single
    # lane-dense axis and zero-pad it to a multiple of the lane tile.  This removes
    # every lane-strided gather / lane shift from the kernel.
    taps = []
    for kh in range(k):
        for kw in range(k):
            taps.append(jax.lax.slice(
                x,
                (0, 0, kh, kw),
                (n, c, kh + s * (oh - 1) + 1, kw + s * (ow - 1) + 1),
                (1, 1, s, s)))                                 # (N, C, OH, OW) each
    x_taps = jnp.stack(taps, axis=0).reshape(k * k, n, c, p)
    if p_pad != p:
        x_taps = jnp.pad(x_taps, ((0, 0), (0, 0), (0, 0), (0, p_pad - p)))

    wdw = w_dw.reshape(c, k * k)        # tap order matches the stack order above
    wpw = w_pw.reshape(o, c)

    kernel = functools.partial(_dws_kernel, k2=k * k)

    out_flat = pl.pallas_call(
        kernel,
        out_shape=jax.ShapeDtypeStruct((n, o, p_pad), x.dtype),
        grid_spec=pltpu.PrefetchScalarGridSpec(
            num_scalar_prefetch=0,
            grid=(n, p_pad // p_tile),
            in_specs=[
                pl.BlockSpec((k * k, 1, c, p_tile), lambda i, j: (0, i, 0, j)),
                pl.BlockSpec((c, k * k), lambda i, j: (0, 0)),
                pl.BlockSpec((o, c), lambda i, j: (0, 0)),
            ],
            out_specs=pl.BlockSpec((1, o, p_tile), lambda i, j: (i, 0, j)),
            scratch_shapes=[pltpu.VMEM((c, p_tile), jnp.float32)],
        ),
        compiler_params=pltpu.CompilerParams(
            dimension_semantics=("parallel", "parallel"),
            vmem_limit_bytes=32 * 1024 * 1024),
    )(x_taps, wdw, wpw)

    # Strip lane padding and restore (N, O, OH, OW).
    return out_flat[:, :, :p].reshape(n, o, oh, ow)


def _reference(x, w_dw, w_pw, *, stride):
    c = x.shape[1]
    dw = jax.lax.conv_general_dilated(
        x, w_dw, window_strides=(stride, stride), padding="VALID",
        dimension_numbers=("NCHW", "OIHW", "NCHW"), feature_group_count=c)
    pw = jax.lax.conv_general_dilated(
        dw, w_pw, window_strides=(1, 1), padding="VALID",
        dimension_numbers=("NCHW", "OIHW", "NCHW"))
    return pw


if __name__ == "__main__":
    # Small, deterministic example consistent with the module's forward pass.
    N, C_IN, C_OUT, H, W = 2, 4, 8, 16, 16
    K, STRIDE = 3, 1

    key = jax.random.PRNGKey(0)
    k_x, k_dw, k_pw = jax.random.split(key, 3)

    x = jax.random.normal(k_x, (N, C_IN, H, W), dtype=jnp.float32)
    # nn.Conv2d(groups=C_IN) weight shape: (C_IN, 1, K, K); pointwise: (C_OUT, C_IN, 1, 1)
    w_dw = jax.random.normal(k_dw, (C_IN, 1, K, K), dtype=jnp.float32) * 0.1
    w_pw = jax.random.normal(k_pw, (C_OUT, C_IN, 1, 1), dtype=jnp.float32) * 0.1

    fn1 = jax.jit(functools.partial(depthwise_separable_conv, stride=STRIDE))
    out = jax.block_until_ready(fn1(x, w_dw, w_pw))
    ref = _reference(x, w_dw, w_pw, stride=STRIDE)
    assert out.shape == ref.shape, (out.shape, ref.shape)
    assert jnp.allclose(out, ref, atol=1e-4, rtol=1e-4), "mismatch vs XLA conv reference"

    # Also exercise the strided (stride=2) tap-extraction path.
    fn2 = jax.jit(functools.partial(depthwise_separable_conv, stride=2))
    out2 = jax.block_until_ready(fn2(x, w_dw, w_pw))
    ref2 = _reference(x, w_dw, w_pw, stride=2)
    assert out2.shape == ref2.shape, (out2.shape, ref2.shape)
    assert jnp.allclose(out2, ref2, atol=1e-4, rtol=1e-4), "mismatch (stride=2)"

    print("KERNEL_OK")
</pallas_src>

<mosaic_0001>
module attributes {stable_mosaic.version = 11 : i64} {
  func.func @_dws_kernel(%arg0: i32, %arg1: i32, %arg2: memref<9x1x4x256xf32, #tpu.memory_space<vmem>>, %arg3: memref<4x9xf32, #tpu.memory_space<vmem>>, %arg4: memref<8x4xf32, #tpu.memory_space<vmem>>, %arg5: memref<1x8x256xf32, #tpu.memory_space<vmem>>, %arg6: memref<4x256xf32, #tpu.memory_space<vmem>>) attributes {dimension_semantics = [#tpu.dimension_semantics<parallel>, #tpu.dimension_semantics<parallel>], iteration_bounds = array<i64: 2, 1>, scalar_prefetch = 0 : i64, scratch_operands = 1 : i64, tpu.core_type = #tpu.core_type<tc>, window_params = [{transform_indices = @transform_0, window_bounds = array<i64: 9, 1, 4, 256>}, {pipeline_mode = #tpu.pipeline_mode<synchronous>, transform_indices = @transform_1, window_bounds = array<i64: 4, 9>}, {pipeline_mode = #tpu.pipeline_mode<synchronous>, transform_indices = @transform_2, window_bounds = array<i64: 8, 4>}, {transform_indices = @transform_3, window_bounds = array<i64: 1, 8, 256>}]} {
    %c0 = arith.constant 0 : index
    %c0_0 = arith.constant 0 : index
    %0 = vector.load %arg3[%c0, %c0_0] : memref<4x9xf32, #tpu.memory_space<vmem>>, vector<4x9xf32>
    %c0_1 = arith.constant 0 : index
    %c0_2 = arith.constant 0 : index
    %c0_3 = arith.constant 0 : index
    %c0_4 = arith.constant 0 : index
    %1 = vector.load %arg2[%c0_1, %c0_2, %c0_3, %c0_4] : memref<9x1x4x256xf32, #tpu.memory_space<vmem>>, vector<1x1x4x256xf32>
    %2 = vector.shape_cast %1 : vector<1x1x4x256xf32> to vector<4x256xf32>
    %3 = vector.extract_strided_slice %0 {offsets = [0, 0], sizes = [4, 1], strides = [1, 1]} : vector<4x9xf32> to vector<4x1xf32>
    %4 = vector.broadcast %3 : vector<4x1xf32> to vector<4x256xf32>
    %5 = arith.mulf %2, %4 : vector<4x256xf32>
    %c0_5 = arith.constant 0 : index
    %c0_6 = arith.constant 0 : index
    %6 = vector.load %arg6[%c0_5, %c0_6] : memref<4x256xf32, #tpu.memory_space<vmem>>, vector<4x256xf32>
    tpu.vector_store %arg6[%c0_5, %c0_6], %5 {strides = array<i32>} : memref<4x256xf32, #tpu.memory_space<vmem>>, vector<4x256xf32>,
    %c0_7 = arith.constant 0 : index
    %c0_8 = arith.constant 0 : index
    %7 = vector.load %arg6[%c0_7, %c0_8] : memref<4x256xf32, #tpu.memory_space<vmem>>, vector<4x256xf32>
    %c1 = arith.constant 1 : index
    %c0_9 = arith.constant 0 : index
    %c0_10 = arith.constant 0 : index
    %c0_11 = arith.constant 0 : index
    %8 = vector.load %arg2[%c1, %c0_9, %c0_10, %c0_11] : memref<9x1x4x256xf32, #tpu.memory_space<vmem>>, vector<1x1x4x256xf32>
    %9 = vector.shape_cast %8 : vector<1x1x4x256xf32> to vector<4x256xf32>
    %10 = vector.extract_strided_slice %0 {offsets = [0, 1], sizes = [4, 1], strides = [1, 1]} : vector<4x9xf32> to vector<4x1xf32>
    %11 = vector.broadcast %10 : vector<4x1xf32> to vector<4x256xf32>
    %12 = arith.mulf %9, %11 : vector<4x256xf32>
    %13 = arith.addf %7, %12 : vector<4x256xf32>
    %c0_12 = arith.constant 0 : index
    %c0_13 = arith.constant 0 : index
    %14 = vector.load %arg6[%c0_12, %c0_13] : memref<4x256xf32, #tpu.memory_space<vmem>>, vector<4x256xf32>
    tpu.vector_store %arg6[%c0_12, %c0_13], %13 {strides = array<i32>} : memref<4x256xf32, #tpu.memory_space<vmem>>, vector<4x256xf32>,
    %c0_14 = arith.constant 0 : index
    %c0_15 = arith.constant 0 : index
    %15 = vector.load %arg6[%c0_14, %c0_15] : memref<4x256xf32, #tpu.memory_space<vmem>>, vector<4x256xf32>
    %c2 = arith.constant 2 : index
    %c0_16 = arith.constant 0 : index
    %c0_17 = arith.constant 0 : index
    %c0_18 = arith.constant 0 : index
    %16 = vector.load %arg2[%c2, %c0_16, %c0_17, %c0_18] : memref<9x1x4x256xf32, #tpu.memory_space<vmem>>, vector<1x1x4x256xf32>
    %17 = vector.shape_cast %16 : vector<1x1x4x256xf32> to vector<4x256xf32>
    %18 = vector.extract_strided_slice %0 {offsets = [0, 2], sizes = [4, 1], strides = [1, 1]} : vector<4x9xf32> to vector<4x1xf32>
    %19 = vector.broadcast %18 : vector<4x1xf32> to vector<4x256xf32>
    %20 = arith.mulf %17, %19 : vector<4x256xf32>
    %21 = arith.addf %15, %20 : vector<4x256xf32>
    %c0_19 = arith.constant 0 : index
    %c0_20 = arith.constant 0 : index
    %22 = vector.load %arg6[%c0_19, %c0_20] : memref<4x256xf32, #tpu.memory_space<vmem>>, vector<4x256xf32>
    tpu.vector_store %arg6[%c0_19, %c0_20], %21 {strides = array<i32>} : memref<4x256xf32, #tpu.memory_space<vmem>>, vector<4x256xf32>,
    %c0_21 = arith.constant 0 : index
    %c0_22 = arith.constant 0 : index
    %23 = vector.load %arg6[%c0_21, %c0_22] : memref<4x256xf32, #tpu.memory_space<vmem>>, vector<4x256xf32>
    %c3 = arith.constant 3 : index
    %c0_23 = arith.constant 0 : index
    %c0_24 = arith.constant 0 : index
    %c0_25 = arith.constant 0 : index
    %24 = vector.load %arg2[%c3, %c0_23, %c0_24, %c0_25] : memref<9x1x4x256xf32, #tpu.memory_space<vmem>>, vector<1x1x4x256xf32>
    %25 = vector.shape_cast %24 : vector<1x1x4x256xf32> to vector<4x256xf32>
    %26 = vector.extract_strided_slice %0 {offsets = [0, 3], sizes = [4, 1], strides = [1, 1]} : vector<4x9xf32> to vector<4x1xf32>
    %27 = vector.broadcast %26 : vector<4x1xf32> to vector<4x256xf32>
    %28 = arith.mulf %25, %27 : vector<4x256xf32>
    %29 = arith.addf %23, %28 : vector<4x256xf32>
    %c0_26 = arith.constant 0 : index
    %c0_27 = arith.constant 0 : index
    %30 = vector.load %arg6[%c0_26, %c0_27] : memref<4x256xf32, #tpu.memory_space<vmem>>, vector<4x256xf32>
    tpu.vector_store %arg6[%c0_26, %c0_27], %29 {strides = array<i32>} : memref<4x256xf32, #tpu.memory_space<vmem>>, vector<4x256xf32>,
    %c0_28 = arith.constant 0 : index
    %c0_29 = arith.constant 0 : index
    %31 = vector.load %arg6[%c0_28, %c0_29] : memref<4x256xf32, #tpu.memory_space<vmem>>, vector<4x256xf32>
    %c4 = arith.constant 4 : index
    %c0_30 = arith.constant 0 : index
    %c0_31 = arith.constant 0 : index
    %c0_32 = arith.constant 0 : index
    %32 = vector.load %arg2[%c4, %c0_30, %c0_31, %c0_32] : memref<9x1x4x256xf32, #tpu.memory_space<vmem>>, vector<1x1x4x256xf32>
    %33 = vector.shape_cast %32 : vector<1x1x4x256xf32> to vector<4x256xf32>
    %34 = vector.extract_strided_slice %0 {offsets = [0, 4], sizes = [4, 1], strides = [1, 1]} : vector<4x9xf32> to vector<4x1xf32>
    %35 = vector.broadcast %34 : vector<4x1xf32> to vector<4x256xf32>
    %36 = arith.mulf %33, %35 : vector<4x256xf32>
    %37 = arith.addf %31, %36 : vector<4x256xf32>
    %c0_33 = arith.constant 0 : index
    %c0_34 = arith.constant 0 : index
    %38 = vector.load %arg6[%c0_33, %c0_34] : memref<4x256xf32, #tpu.memory_space<vmem>>, vector<4x256xf32>
    tpu.vector_store %arg6[%c0_33, %c0_34], %37 {strides = array<i32>} : memref<4x256xf32, #tpu.memory_space<vmem>>, vector<4x256xf32>,
    %c0_35 = arith.constant 0 : index
    %c0_36 = arith.constant 0 : index
    %39 = vector.load %arg6[%c0_35, %c0_36] : memref<4x256xf32, #tpu.memory_space<vmem>>, vector<4x256xf32>
    %c5 = arith.constant 5 : index
    %c0_37 = arith.constant 0 : index
    %c0_38 = arith.constant 0 : index
    %c0_39 = arith.constant 0 : index
    %40 = vector.load %arg2[%c5, %c0_37, %c0_38, %c0_39] : memref<9x1x4x256xf32, #tpu.memory_space<vmem>>, vector<1x1x4x256xf32>
    %41 = vector.shape_cast %40 : vector<1x1x4x256xf32> to vector<4x256xf32>
    %42 = vector.extract_strided_slice %0 {offsets = [0, 5], sizes = [4, 1], strides = [1, 1]} : vector<4x9xf32> to vector<4x1xf32>
    %43 = vector.broadcast %42 : vector<4x1xf32> to vector<4x256xf32>
    %44 = arith.mulf %41, %43 : vector<4x256xf32>
    %45 = arith.addf %39, %44 : vector<4x256xf32>
    %c0_40 = arith.constant 0 : index
    %c0_41 = arith.constant 0 : index
    %46 = vector.load %arg6[%c0_40, %c0_41] : memref<4x256xf32, #tpu.memory_space<vmem>>, vector<4x256xf32>
    tpu.vector_store %arg6[%c0_40, %c0_41], %45 {strides = array<i32>} : memref<4x256xf32, #tpu.memory_space<vmem>>, vector<4x256xf32>,
    %c0_42 = arith.constant 0 : index
    %c0_43 = arith.constant 0 : index
    %47 = vector.load %arg6[%c0_42, %c0_43] : memref<4x256xf32, #tpu.memory_space<vmem>>, vector<4x256xf32>
    %c6 = arith.constant 6 : index
    %c0_44 = arith.constant 0 : index
    %c0_45 = arith.constant 0 : index
    %c0_46 = arith.constant 0 : index
    %48 = vector.load %arg2[%c6, %c0_44, %c0_45, %c0_46] : memref<9x1x4x256xf32, #tpu.memory_space<vmem>>, vector<1x1x4x256xf32>
    %49 = vector.shape_cast %48 : vector<1x1x4x256xf32> to vector<4x256xf32>
    %50 = vector.extract_strided_slice %0 {offsets = [0, 6], sizes = [4, 1], strides = [1, 1]} : vector<4x9xf32> to vector<4x1xf32>
    %51 = vector.broadcast %50 : vector<4x1xf32> to vector<4x256xf32>
    %52 = arith.mulf %49, %51 : vector<4x256xf32>
    %53 = arith.addf %47, %52 : vector<4x256xf32>
    %c0_47 = arith.constant 0 : index
    %c0_48 = arith.constant 0 : index
    %54 = vector.load %arg6[%c0_47, %c0_48] : memref<4x256xf32, #tpu.memory_space<vmem>>, vector<4x256xf32>
    tpu.vector_store %arg6[%c0_47, %c0_48], %53 {strides = array<i32>} : memref<4x256xf32, #tpu.memory_space<vmem>>, vector<4x256xf32>,
    %c0_49 = arith.constant 0 : index
    %c0_50 = arith.constant 0 : index
    %55 = vector.load %arg6[%c0_49, %c0_50] : memref<4x256xf32, #tpu.memory_space<vmem>>, vector<4x256xf32>
    %c7 = arith.constant 7 : index
    %c0_51 = arith.constant 0 : index
    %c0_52 = arith.constant 0 : index
    %c0_53 = arith.constant 0 : index
    %56 = vector.load %arg2[%c7, %c0_51, %c0_52, %c0_53] : memref<9x1x4x256xf32, #tpu.memory_space<vmem>>, vector<1x1x4x256xf32>
    %57 = vector.shape_cast %56 : vector<1x1x4x256xf32> to vector<4x256xf32>
    %58 = vector.extract_strided_slice %0 {offsets = [0, 7], sizes = [4, 1], strides = [1, 1]} : vector<4x9xf32> to vector<4x1xf32>
    %59 = vector.broadcast %58 : vector<4x1xf32> to vector<4x256xf32>
    %60 = arith.mulf %57, %59 : vector<4x256xf32>
    %61 = arith.addf %55, %60 : vector<4x256xf32>
    %c0_54 = arith.constant 0 : index
    %c0_55 = arith.constant 0 : index
    %62 = vector.load %arg6[%c0_54, %c0_55] : memref<4x256xf32, #tpu.memory_space<vmem>>, vector<4x256xf32>
    tpu.vector_store %arg6[%c0_54, %c0_55], %61 {strides = array<i32>} : memref<4x256xf32, #tpu.memory_space<vmem>>, vector<4x256xf32>,
    %c0_56 = arith.constant 0 : index
    %c0_57 = arith.constant 0 : index
    %63 = vector.load %arg6[%c0_56, %c0_57] : memref<4x256xf32, #tpu.memory_space<vmem>>, vector<4x256xf32>
    %c8 = arith.constant 8 : index
    %c0_58 = arith.constant 0 : index
    %c0_59 = arith.constant 0 : index
    %c0_60 = arith.constant 0 : index
    %64 = vector.load %arg2[%c8, %c0_58, %c0_59, %c0_60] : memref<9x1x4x256xf32, #tpu.memory_space<vmem>>, vector<1x1x4x256xf32>
    %65 = vector.shape_cast %64 : vector<1x1x4x256xf32> to vector<4x256xf32>
    %66 = vector.extract_strided_slice %0 {offsets = [0, 8], sizes = [4, 1], strides = [1, 1]} : vector<4x9xf32> to vector<4x1xf32>
    %67 = vector.broadcast %66 : vector<4x1xf32> to vector<4x256xf32>
    %68 = arith.mulf %65, %67 : vector<4x256xf32>
    %69 = arith.addf %63, %68 : vector<4x256xf32>
    %c0_61 = arith.constant 0 : index
    %c0_62 = arith.constant 0 : index
    %70 = vector.load %arg6[%c0_61, %c0_62] : memref<4x256xf32, #tpu.memory_space<vmem>>, vector<4x256xf32>
    tpu.vector_store %arg6[%c0_61, %c0_62], %69 {strides = array<i32>} : memref<4x256xf32, #tpu.memory_space<vmem>>, vector<4x256xf32>,
    %c0_63 = arith.constant 0 : index
    %c0_64 = arith.constant 0 : index
    %71 = vector.load %arg4[%c0_63, %c0_64] : memref<8x4xf32, #tpu.memory_space<vmem>>, vector<8x4xf32>
    %c0_65 = arith.constant 0 : index
    %c0_66 = arith.constant 0 : index
    %72 = vector.load %arg6[%c0_65, %c0_66] : memref<4x256xf32, #tpu.memory_space<vmem>>, vector<4x256xf32>
    %cst = arith.constant dense<0.000000e+00> : vector<8x256xf32>
    %73 = tpu.matmul %71, %72, %cst {dimension_numbers = #tpu.dot_dimension_numbers<[1], [0], [0], [1], [0, 0, 1, 1], [], []>} : vector<8x4xf32>, vector<4x256xf32>, vector<8x256xf32> -> vector<8x256xf32>
    %c0_67 = arith.constant 0 : index
    %c0_68 = arith.constant 0 : index
    %c0_69 = arith.constant 0 : index
    %74 = vector.load %arg5[%c0_67, %c0_68, %c0_69] : memref<1x8x256xf32, #tpu.memory_space<vmem>>, vector<1x8x256xf32>
    %75 = vector.shape_cast %74 : vector<1x8x256xf32> to vector<8x256xf32>
    %76 = vector.shape_cast %73 : vector<8x256xf32> to vector<1x8x256xf32>
    tpu.vector_store %arg5[%c0_67, %c0_68, %c0_69], %76 {strides = array<i32>} : memref<1x8x256xf32, #tpu.memory_space<vmem>>, vector<1x8x256xf32>,
    return
  }
  func.func @transform_0(%arg0: i32, %arg1: i32) -> (i32, i32, i32, i32) {
    %c0_i32 = arith.constant 0 : i32
    %c0_i32_0 = arith.constant 0 : i32
    %c0_i32_1 = arith.constant 0 : i32
    return %c0_i32, %arg0, %c0_i32_0, %arg1 : i32, i32, i32, i32
  }
  func.func @transform_1(%arg0: i32, %arg1: i32) -> (i32, i32) {
    %c0_i32 = arith.constant 0 : i32
    %c0_i32_0 = arith.constant 0 : i32
    %c0_i32_1 = arith.constant 0 : i32
    return %c0_i32, %c0_i32_0 : i32, i32
  }
  func.func @transform_2(%arg0: i32, %arg1: i32) -> (i32, i32) {
    %c0_i32 = arith.constant 0 : i32
    %c0_i32_0 = arith.constant 0 : i32
    %c0_i32_1 = arith.constant 0 : i32
    return %c0_i32, %c0_i32_0 : i32, i32
  }
  func.func @transform_3(%arg0: i32, %arg1: i32) -> (i32, i32, i32) {
    %c0_i32 = arith.constant 0 : i32
    %c0_i32_0 = arith.constant 0 : i32
    return %arg0, %c0_i32, %arg1 : i32, i32, i32
  }
}

</mosaic_0001>

<bundles_post_ra>
// kernel: depthwise_separable_conv.1
= control target key start
LH: loop header
LB: loop body
LE: loop exit
PB: predicated region body
PF: predicated region fallthrough
CT: control target
= control target key end

     0   :  { %s752_s12 = smov 0   ;;  %s754_s13 = smov 0   ;;  %s835_s0 = inlined_call_operand.vmem [shape: f32[9,2,4,256], index: 0, kind: input, shape index: {}]   ;;  %s836_s1 = inlined_call_operand.vmem [shape: f32[4,9], index: 1, kind: input, shape index: {}]   ;;  %s837_s2 = inlined_call_operand.vmem [shape: f32[8,4], index: 2, kind: input, shape index: {}]   ;;  %s838_s3 = inlined_call_operand.vmem [shape: f32[2,8,256], index: 3, kind: output, shape index: {}]  }
   0x1   :  { %s756_s14 = smov 0   ;;  %s758_s15 = smov 0  }
   0x2   :  { %s760_s16 = smov 0  }
   0x3 LB: > { %s25_s17 = sadd.s32 1, %s715_s15  ;;  %p41_p1 = scmp.ne.s32.totalorder %s707_s13, %s703_s12  ;;  %s719_s16 = sphi %s760_s16, %s13_s16   ;;  %s715_s15 = sphi %s758_s15, %s842_s15   ;;  %s711_s14 = sphi %s756_s14, %s841_s14   ;;  %s707_s13 = sphi %s754_s13, %s840_s13   ;;  %s703_s12 = sphi %s752_s12, %s839_s12  }
   0x4   : > { %p27_p0 = scmp.ge.s32.totalorder %s25_s17, 2  ;;  %p42_p2 = scmp.eq.s32.totalorder %s719_s16, 0 }
   0x5   : > { %s34_s19 = sadd.s32 1, %s707_s13  ;;  %p598_p5 = scmp.ge.s32.totalorder %s719_s16, 2 }
   0x6   : > { %s844_s17 = smov (%p27_p0, %s25_s17), 0  ;;  %p43_p3 = por %p42_p2, %p41_p1 }
   0x7   : > { %s29_s18 = ssub.s32 %s715_s15, %s844_s17  ;;  %143 = sbr.rel (%p598_p5) target bundleno = 21 (0x15), region = 24 }
   0x8   : > { %p32_p4 = scmp.eq.s32.totalorder %s29_s18, 0 }
   0xa   : > { %s787_s20 = scalar_select %p32_p4, %s707_s13, %s34_s19  }
   0xc   : > { %146 = sbr.rel (!%p43_p3) target bundleno = 21 (0x15), region = 28  ;;  %s148_s21 = sand.u32 (%p43_p3), 1, %s707_s13  }
   0xd   : > { %s617_s22 = sshll.u32 (%p43_p3), %s715_s15, 3  ;;  %s619_s23 = smul.u32 (%p43_p3), 72, %s148_s21 }
   0xe   : > { %s155_s26 = scalar_lea.vmem (%p43_p3), %s835_s0, %s617_s22 }
   0xf   : > { %v200_v0 = vld [vmem:[%s155_s26] sm:$0xff] (%p43_p3)  ;;  %v202_v1 = vld [vmem:[%s155_s26 + $0x10] sm:$0xff] (%p43_p3)  ;;  %s150_s27 = scalar_lea.vmem (%p43_p3), [#allocation3], %s619_s23 }
  0x10   : > { %v204_v2 = vld [vmem:[%s155_s26 + $0x20] sm:$0xff] (%p43_p3)  ;;  %v206_v3 = vld [vmem:[%s155_s26 + $0x30] sm:$0xff] (%p43_p3)  ;;  %201 = vst [vmem:[%s150_s27] sm:$0xff] (%p43_p3), %v200_v0  ;;  %203 = vst [vmem:[%s150_s27 + $0x8] sm:$0xff] (%p43_p3), %v202_v1 }
  0x11   : > { %v208_v4 = vld [vmem:[%s155_s26 + $0x40] sm:$0xff]  ;;  %v210_v5 = vld [vmem:[%s155_s26 + $0x50] sm:$0xff]  ;;  %205 = vst [vmem:[%s150_s27 + $0x10] sm:$0xff] %v204_v2  ;;  %207 = vst [vmem:[%s150_s27 + $0x18] sm:$0xff] %v206_v3 }
  0x12   : > { %209 = vst [vmem:[%s150_s27 + $0x20] sm:$0xff] %v208_v4  ;;  %211 = vst [vmem:[%s150_s27 + $0x28] sm:$0xff] %v210_v5  ;;  %v212_v6 = vld [vmem:[%s155_s26 + $0x60] sm:$0xff]  ;;  %v214_v7 = vld [vmem:[%s155_s26 + $0x70] sm:$0xff] }
  0x13   : > { %v216_v8 = vld [vmem:[%s155_s26 + $0x80] sm:$0xff]  ;;  %213 = vst [vmem:[%s150_s27 + $0x30] sm:$0xff] %v212_v6  ;;  %215 = vst [vmem:[%s150_s27 + $0x38] sm:$0xff] %v214_v7 }
  0x14   : > { %217 = vst [vmem:[%s150_s27 + $0x40] sm:$0xff] %v216_v8 }
  0x15 PF: > { %p601_p6 = scmp.ge.s32.totalorder %s719_s16, 1  ;;  %p222_p7 = scmp.lt.s32.totalorder %s719_s16, 3 }
  0x17   : > { %p223_p8 = pnand %p601_p6, %p222_p7 }
  0x18   : > { %s229_s30 = sand.u32 (!%p223_p8), 1, %s703_s12   ;;  %p258_p9 = scmp.lt.s32.totalorder (!%p223_p8), %s711_s14, 1 }
  0x19   : > { %226 = sbr.rel (%p223_p8) target bundleno = 384 (0x180), region = 66 }
  0x1a   : > { %s620_s4 = smul.u32 (!%p223_p8), 72, %s229_s30 }
  0x1c   : > { %s801_s5 = scalar_lea.vmem (!%p223_p8), [#allocation3], %s620_s4 }
  0x1e   : > { %v267_v9 = vld [vmem:[%s836_s1] sm:$0xf]  ;;  %v721_v10 = vmov 2   ;;  %v722_v11 = vmov 0   ;;  %v723_v12 = vmov 3   ;;  %v724_v13 = vmov 1  }
  0x1f   : > { %674 = vset.pattern.permute.xlu1 %v721_v10  ;;  %672 = vset.pattern.permute.xlu0 %v722_v11  ;;  %v725_v14 = vmov 4   ;;  %v726_v15 = vmov 5   ;;  %v727_v16 = vmov 6   ;;  %v728_v17 = vmov 8   ;;  %v268_v29 = vld [vmem:[%s801_s5] sm:$0xff]  ;;  %v604_v32 = vld [vmem:[%s801_s5 + $0x8] sm:$0xff] }
  0x20   : > { %304 = vperm.xlu1 %674, %v267_v9   ;;  %271 = vperm.xlu0 %672, %v267_v9   ;;  %v729_v18 = vmov 7   ;;  %v730_v19 = vmov 0.0   ;;  %v731_v20 = vmov 839922192   ;;  %v276_v22 = vlaneseq  ;;  %v605_v35 = vld [vmem:[%s801_s5 + $0x10] sm:$0xff]  ;;  %v606_v39 = vld [vmem:[%s801_s5 + $0x18] sm:$0xff] }
  0x21   : > { %496 = vmatprep.mubr.f32.mxu0 %v730_v19  ;;  %v274_v21 = vunpack.c.l.s4 %v731_v20  ;;  %v607_v43 = vld [vmem:[%s801_s5 + $0x20] sm:$0xff]  ;;  %v608_v49 = vld [vmem:[%s801_s5 + $0x28] sm:$0xff]  ;;  %v609_v55 = vld [vmem:[%s801_s5 + $0x30] sm:$0xff]  ;;  %vm427_vm0 = vcmask 1043456   ;;  %vm423_vm1 = vcmask 31744   ;;  %s846_s14 = smov (!%p258_p9, %s711_s14), 1 }
  0x22   : > { %v277_v24 = vshrl.u32 %v276_v22, 7  ;;  %v610_v62 = vld [vmem:[%s801_s5 + $0x38] sm:$0xff]  ;;  %v611_v63 = vld [vmem:[%s801_s5 + $0x40] sm:$0xff]  ;;  %s618_s8 = sshll.u32 %s846_s14, 4 }
  0x23   : > { %v275_v23 = vunpack.c.0.s8 %v274_v21  ;;  %v419_v7 = vld [vmem:[%s837_s2] sm:$0xff]  ;;  %s265_s11 = scalar_lea.vmem %s838_s3, %s618_s8 }
  0x24   : > { %675 = vset.pattern.permute.xlu1 %v723_v12  ;;  %673 = vset.pattern.permute.xlu0 %v724_v13 }
  0x25   : > { %321 = vperm.xlu1 %675, %v267_v9   ;;  %287 = vperm.xlu0 %673, %v267_v9   ;;  %v278_v27 = vsub.s32 %v275_v23, %v277_v24 }
  0x29   : > { %676 = vset.pattern.permute.xlu1 %v725_v14  ;;  %677 = vset.pattern.permute.xlu0 %v726_v15 }
  0x2a   : > { %338 = vperm.xlu1 %676, %v267_v9   ;;  %355 = vperm.xlu0 %677, %v267_v9  }
  0x2e   : > { %678 = vset.pattern.permute.xlu1 %v727_v16  ;;  %680 = vset.pattern.permute.xlu0 %v728_v17 }
  0x2f   : > { %372 = vperm.xlu1 %678, %v267_v9   ;;  %406 = vperm.xlu0 %680, %v267_v9  }
  0x33   : > { %679 = vset.pattern.permute.xlu1 %v729_v18 }
  0x34   : > { %389 = vperm.xlu1 %679, %v267_v9  }
  0x9b   : > { %v305_v25 = vpop.permute.xlu1 %304  ;;  %v272_v26 = vpop.permute.xlu0 %271 }
  0x9c   : > { %v279_v28 = vrot.slane %v272_v26, %v278_v27  ;;  %v312_v33 = vrot.slane %v305_v25, %v278_v27 }
  0x9e   : > { %v281_v36 = vmul.f32 %v279_v28, %v268_v29  ;;  %v314_v40 = vmul.f32 %v605_v35, %v312_v33 }
  0xa0   : > { %v322_v30 = vpop.permute.xlu1 %321  ;;  %v288_v31 = vpop.permute.xlu0 %287 }
  0xa1   : > { %v295_v34 = vrot.slane %v288_v31, %v278_v27  ;;  %v329_v37 = vrot.slane %v322_v30, %v278_v27 }
  0xa3   : > { %v297_v38 = vmul.f32 %v604_v32, %v295_v34  ;;  %v331_v47 = vmul.f32 %v606_v39, %v329_v37 }
  0xa5   : > { %v298_v41 = vadd.f32 %v297_v38, %v281_v36  ;;  %v339_v42 = vpop.permute.xlu1 %338  ;;  %v356_v44 = vpop.permute.xlu0 %355 }
  0xa6   : > { %v346_v45 = vrot.slane %v339_v42, %v278_v27  ;;  %v363_v46 = vrot.slane %v356_v44, %v278_v27 }
  0xa7   : > { %v315_v48 = vadd.f32 %v314_v40, %v298_v41 }
  0xa8   : > { %v348_v50 = vmul.f32 %v607_v43, %v346_v45  ;;  %v365_v52 = vmul.f32 %v608_v49, %v363_v46 }
  0xa9   : > { %v332_v51 = vadd.f32 %v331_v47, %v315_v48 }
  0xaa   : > { %v373_v53 = vpop.permute.xlu1 %372  ;;  %v407_v57 = vpop.permute.xlu0 %406 }
  0xab   : > { %v349_v54 = vadd.f32 %v348_v50, %v332_v51  ;;  %v380_v56 = vrot.slane %v373_v53, %v278_v27  ;;  %v414_v60 = vrot.slane %v407_v57, %v278_v27 }
  0xad   : > { %v366_v58 = vadd.f32 %v365_v52, %v349_v54  ;;  %v382_v59 = vmul.f32 %v609_v55, %v380_v56  ;;  %v416_v3 = vmul.f32 %v611_v63, %v414_v60 }
  0xaf   : > { %v390_v61 = vpop.permute.xlu1 %389  ;;  %v383_v1 = vadd.f32 %v382_v59, %v366_v58 }
  0xb0   : > { %v397_v0 = vrot.slane %v390_v61, %v278_v27 }
  0xb2   : > { %v399_v2 = vmul.f32 %v610_v62, %v397_v0 }
  0xb4   : > { %v400_v4 = vadd.f32 %v399_v2, %v383_v1 }
  0xb6   : > { %v417_v5 = vadd.f32 %v416_v3, %v400_v4 }
  0xb8   : > { %v422_v6 = vcombine.high %v417_v5, %v417_v5 }
  0xba   : > { %612 = vmatprep.subr.msk.mxu0 %vm427_vm0, %v422_v6 }
  0xbb   : > { %613 = vmatpush1.msk.msra.mxu0 %vm427_vm0, %v417_v5 }
  0xbc   : > { %614 = vmatmul.mubr.msk.f32.vlgmr.msra.gmra.mxu0 %vm423_vm1, %v419_v7 }
 0x17c   : > { %v498_v8 = vpop.f32.mrf.mxu0 }
 0x17d   : > { %503 = vst [vmem:[%s265_s11] sm:$0xff] %v498_v8 }
 0x17e   : > { %v500_v9 = vpop.f32.mrf.mxu0 }
 0x17f   : > { %504 = vst [vmem:[%s265_s11 + $0x8] sm:$0xff] %v500_v9 }
 0x180 PF: > { %s13_s16 = sadd.s32 1, %s719_s16   ;;  %s839_s12 = smov %s707_s13 }
 0x181   : > { %p10_p10 = scmp.ge.s32.totalorder %s13_s16, 4   ;;  %s840_s13 = smov %s787_s20 }
 0x182   : > { %s841_s14 = smov %s715_s15  ;;  %s842_s15 = smov %s844_s17 }
 0x183   :  { %12 = sbr.rel (!%p10_p10) target bundleno = 3 (0x3), region = 113 }

</bundles_post_ra>
